<compile_context>
chip_gen: v6e
topology: v6e:2x2x1
jax: 0.10.0
libtpu: 0.0.40
codegen_flags: <defaults>
</compile_context>

<pallas_src>
import functools

import numpy as np
import jax
import jax.numpy as jnp
from jax.experimental import pallas as pl
from jax.experimental.pallas import tpu as pltpu


# ----------------------------- Pallas kernel -------------------------------


def fused_conv_topk_kernel(p_ref, w_ref, b_ref, vp_ref, ip_ref, vn_ref, in_ref,
                           *, c, k):
    # p_ref : (1, c, KF, P)   im2col patches for this batch element
    # w_ref : (c, m, KF)      per-group weights (rows = output map)
    # b_ref : (c, m, 1)       per-group bias
    # vp_ref/ip_ref/vn_ref/in_ref : (1, k, m, P)
    #
    # Grouped conv: c small matmuls, each (m,KF)@(KF,P) -> (m,P).  Keeping the
    # per-group results as a Python list lets the top-k be a purely
    # elementwise scan over groups (no cross-lane reduce, no iota).
    feats = []
    for g in range(c):
        acc = jnp.dot(w_ref[g], p_ref[0, g], preferred_element_type=jnp.float32)
        feats.append(acc + b_ref[g])                      # (m, P)

    zero_i = jnp.zeros(feats[0].shape, dtype=jnp.int32)   # hoisted broadcast

    def scan_extreme(work, better):
        # Elementwise argmax/argmin over the c tiles.  Strict comparison with
        # ascending g => lowest index wins ties (matches jax.lax.top_k).
        best_v = work[0]
        best_i = zero_i
        for g in range(1, c):
            take = better(work[g], best_v)
            best_v = jnp.where(take, work[g], best_v)
            best_i = jnp.where(take, jnp.int32(g), best_i)
        return best_v, best_i

    # ---- top-k (largest) over the group axis ----
    work = list(feats)
    pos_v, pos_i = [], []
    for j in range(k):
        bv, bi = scan_extreme(work, lambda a, b: a > b)
        pos_v.append(bv)
        pos_i.append(bi)
        if j + 1 < k:
            work = [jnp.where(bi == g, -jnp.inf, work[g]) for g in range(c)]
    vp_ref[0] = jnp.stack(pos_v, axis=0)                  # single (k,m,P) store
    ip_ref[0] = jnp.stack(pos_i, axis=0)

    # ---- bottom-k (smallest) == torch topk(-x) with values re-negated ----
    work = list(feats)
    neg_v, neg_i = [], []
    for j in range(k):
        bv, bi = scan_extreme(work, lambda a, b: a < b)
        neg_v.append(bv)                                  # already -(-x).max = min
        neg_i.append(bi)
        if j + 1 < k:
            work = [jnp.where(bi == g, jnp.inf, work[g]) for g in range(c)]
    vn_ref[0] = jnp.stack(neg_v, axis=0)
    in_ref[0] = jnp.stack(neg_i, axis=0)


# ------------------------------- wrapper ------------------------------------


def conv_indexer_forward(x, weight, bias, *, c, m, f, k):
    """x: (B, c*m, H, W) NCHW float32. Returns code dict like the torch module."""
    B, C, H, W = x.shape
    assert C == c * m
    assert f >= 4, "stride = f // 4 must be positive"
    s = f // 4
    OH = (H - f) // s + 1
    OW = (W - f) // s + 1
    P = OH * OW
    KF = m * f * f

    # im2col in one XLA op.  Output channel order is (in_channel, kh, kw) with
    # the input channel slowest, i.e. channel g*m+ic maps to rows
    # [ (g*m+ic)*f*f , ... ), matching weight.reshape(c, m, KF)'s column order.
    patches = jax.lax.conv_general_dilated_patches(
        x, (f, f), (s, s), "VALID",
        dimension_numbers=("NCHW", "OIHW", "NCHW"))        # (B, C*f*f, OH, OW)
    patches = patches.reshape(B, c, KF, P)                 # (B, c, KF, P)

    w_mat = weight.reshape(c, m, KF)                       # (c, m, KF)
    b_mat = bias.reshape(c, m, 1)                          # (c, m, 1)

    kernel = functools.partial(fused_conv_topk_kernel, c=c, k=k)
    fshape = jax.ShapeDtypeStruct((B, k, m, P), jnp.float32)
    ishape = jax.ShapeDtypeStruct((B, k, m, P), jnp.int32)
    out_spec = pl.BlockSpec((1, k, m, P), lambda b: (b, 0, 0, 0))

    vp, ip, vn, ineg = pl.pallas_call(
        kernel,
        out_shape=(fshape, ishape, fshape, ishape),
        grid=(B,),
        in_specs=[
            pl.BlockSpec((1, c, KF, P), lambda b: (b, 0, 0, 0)),
            pl.BlockSpec((c, m, KF), lambda b: (0, 0, 0)),
            pl.BlockSpec((c, m, 1), lambda b: (0, 0, 0)),
        ],
        out_specs=(out_spec, out_spec, out_spec, out_spec),
        compiler_params=pltpu.CompilerParams(
            dimension_semantics=("parallel",)),
    )(patches, w_mat, b_mat)

    # (B, k, m, P) -> (B, k, m, OH, OW): contiguous split of the last dim (free).
    shp = (B, k, m, OH, OW)
    code = {
        "pos": {"ind": ip.reshape(shp), "val": vp.reshape(shp)},
        "neg": {"ind": ineg.reshape(shp), "val": vn.reshape(shp)},
    }
    return code


# ---------------------------- pure-JAX reference -----------------------------


def reference_forward(x, weight, bias, *, c, m, f, k):
    s = f // 4
    y = jax.lax.conv_general_dilated(
        x, weight, window_strides=(s, s), padding="VALID",
        dimension_numbers=("NCHW", "OIHW", "NCHW"), feature_group_count=c)
    y = y + bias[None, :, None, None]
    B, _, OH, OW = y.shape
    y = y.reshape(B, c, m, OH, OW)
    ym = jnp.moveaxis(y, 1, -1)                     # (B, m, OH, OW, c)
    vp, ip = jax.lax.top_k(ym, k)
    vn, ineg = jax.lax.top_k(-ym, k)
    vp = jnp.moveaxis(vp, -1, 1)
    ip = jnp.moveaxis(ip, -1, 1)
    vn = -jnp.moveaxis(vn, -1, 1)
    ineg = jnp.moveaxis(ineg, -1, 1)
    return vp, ip, vn, ineg


# --------------------------------- main --------------------------------------

if __name__ == "__main__":
    # Module hyper-params (small): c groups, m maps per group, f x f kernel, top-k.
    c, f, k, m = 4, 8, 2, 4
    B, H, W = 2, 16, 16
    C = c * m

    key = jax.random.PRNGKey(0)
    kx, kw_, kb = jax.random.split(key, 3)
    x = jax.random.normal(kx, (B, C, H, W), dtype=jnp.float32)

    # Deterministic Conv2d-style init: U(-1/sqrt(fan_in), 1/sqrt(fan_in)).
    fan_in = m * f * f
    bound = 1.0 / np.sqrt(fan_in)
    weight = jax.random.uniform(kw_, (C, m, f, f), minval=-bound, maxval=bound,
                                dtype=jnp.float32)
    bias = jax.random.uniform(kb, (C,), minval=-bound, maxval=bound,
                              dtype=jnp.float32)

    code = conv_indexer_forward(x, weight, bias, c=c, m=m, f=f, k=k)
    jax.block_until_ready(code)

    # correctness check against a pure-JAX reference
    vp_r, ip_r, vn_r, in_r = reference_forward(x, weight, bias, c=c, m=m, f=f, k=k)
    np.testing.assert_allclose(np.asarray(code["pos"]["val"]), np.asarray(vp_r),
                               rtol=1e-5, atol=1e-5)
    np.testing.assert_allclose(np.asarray(code["neg"]["val"]), np.asarray(vn_r),
                               rtol=1e-5, atol=1e-5)
    assert np.array_equal(np.asarray(code["pos"]["ind"]), np.asarray(ip_r))
    assert np.array_equal(np.asarray(code["neg"]["ind"]), np.asarray(in_r))

    print("KERNEL_OK")
</pallas_src>

<mosaic_0001>
module attributes {stable_mosaic.version = 11 : i64} {
  func.func @fused_conv_topk_kernel(%arg0: i32, %arg1: memref<1x4x256x25xf32, #tpu.memory_space<vmem>>, %arg2: memref<4x4x256xf32, #tpu.memory_space<vmem>>, %arg3: memref<4x4x1xf32, #tpu.memory_space<vmem>>, %arg4: memref<1x2x4x25xf32, #tpu.memory_space<vmem>>, %arg5: memref<1x2x4x25xi32, #tpu.memory_space<vmem>>, %arg6: memref<1x2x4x25xf32, #tpu.memory_space<vmem>>, %arg7: memref<1x2x4x25xi32, #tpu.memory_space<vmem>>) attributes {dimension_semantics = [#tpu.dimension_semantics<parallel>], iteration_bounds = array<i64: 2>, scalar_prefetch = 0 : i64, scratch_operands = 0 : i64, tpu.core_type = #tpu.core_type<tc>, window_params = [{transform_indices = @transform_0, window_bounds = array<i64: 1, 4, 256, 25>}, {pipeline_mode = #tpu.pipeline_mode<synchronous>, transform_indices = @transform_1, window_bounds = array<i64: 4, 4, 256>}, {pipeline_mode = #tpu.pipeline_mode<synchronous>, transform_indices = @transform_2, window_bounds = array<i64: 4, 4, 1>}, {transform_indices = @transform_3, window_bounds = array<i64: 1, 2, 4, 25>}, {transform_indices = @transform_4, window_bounds = array<i64: 1, 2, 4, 25>}, {transform_indices = @transform_5, window_bounds = array<i64: 1, 2, 4, 25>}, {transform_indices = @transform_6, window_bounds = array<i64: 1, 2, 4, 25>}]} {
    %c0 = arith.constant 0 : index
    %c0_0 = arith.constant 0 : index
    %c0_1 = arith.constant 0 : index
    %0 = vector.load %arg2[%c0, %c0_0, %c0_1] : memref<4x4x256xf32, #tpu.memory_space<vmem>>, vector<1x4x256xf32>
    %1 = vector.shape_cast %0 : vector<1x4x256xf32> to vector<4x256xf32>
    %c0_2 = arith.constant 0 : index
    %c0_3 = arith.constant 0 : index
    %c0_4 = arith.constant 0 : index
    %c0_5 = arith.constant 0 : index
    %2 = vector.load %arg1[%c0_2, %c0_3, %c0_4, %c0_5] : memref<1x4x256x25xf32, #tpu.memory_space<vmem>>, vector<1x1x256x25xf32>
    %3 = vector.shape_cast %2 : vector<1x1x256x25xf32> to vector<256x25xf32>
    %cst = arith.constant dense<0.000000e+00> : vector<4x25xf32>
    %4 = tpu.matmul %1, %3, %cst {dimension_numbers = #tpu.dot_dimension_numbers<[1], [0], [0], [1], [0, 0, 1, 1], [], []>} : vector<4x256xf32>, vector<256x25xf32>, vector<4x25xf32> -> vector<4x25xf32>
    %c0_6 = arith.constant 0 : index
    %c0_7 = arith.constant 0 : index
    %c0_8 = arith.constant 0 : index
    %5 = vector.load %arg3[%c0_6, %c0_7, %c0_8] : memref<4x4x1xf32, #tpu.memory_space<vmem>>, vector<1x4x1xf32>
    %6 = vector.shape_cast %5 : vector<1x4x1xf32> to vector<4x1xf32>
    %7 = vector.broadcast %6 : vector<4x1xf32> to vector<4x25xf32>
    %8 = arith.addf %4, %7 : vector<4x25xf32>
    %c1 = arith.constant 1 : index
    %c0_9 = arith.constant 0 : index
    %c0_10 = arith.constant 0 : index
    %9 = vector.load %arg2[%c1, %c0_9, %c0_10] : memref<4x4x256xf32, #tpu.memory_space<vmem>>, vector<1x4x256xf32>
    %10 = vector.shape_cast %9 : vector<1x4x256xf32> to vector<4x256xf32>
    %c0_11 = arith.constant 0 : index
    %c1_12 = arith.constant 1 : index
    %c0_13 = arith.constant 0 : index
    %c0_14 = arith.constant 0 : index
    %11 = vector.load %arg1[%c0_11, %c1_12, %c0_13, %c0_14] : memref<1x4x256x25xf32, #tpu.memory_space<vmem>>, vector<1x1x256x25xf32>
    %12 = vector.shape_cast %11 : vector<1x1x256x25xf32> to vector<256x25xf32>
    %cst_15 = arith.constant dense<0.000000e+00> : vector<4x25xf32>
    %13 = tpu.matmul %10, %12, %cst_15 {dimension_numbers = #tpu.dot_dimension_numbers<[1], [0], [0], [1], [0, 0, 1, 1], [], []>} : vector<4x256xf32>, vector<256x25xf32>, vector<4x25xf32> -> vector<4x25xf32>
    %c1_16 = arith.constant 1 : index
    %c0_17 = arith.constant 0 : index
    %c0_18 = arith.constant 0 : index
    %14 = vector.load %arg3[%c1_16, %c0_17, %c0_18] : memref<4x4x1xf32, #tpu.memory_space<vmem>>, vector<1x4x1xf32>
    %15 = vector.shape_cast %14 : vector<1x4x1xf32> to vector<4x1xf32>
    %16 = vector.broadcast %15 : vector<4x1xf32> to vector<4x25xf32>
    %17 = arith.addf %13, %16 : vector<4x25xf32>
    %c2 = arith.constant 2 : index
    %c0_19 = arith.constant 0 : index
    %c0_20 = arith.constant 0 : index
    %18 = vector.load %arg2[%c2, %c0_19, %c0_20] : memref<4x4x256xf32, #tpu.memory_space<vmem>>, vector<1x4x256xf32>
    %19 = vector.shape_cast %18 : vector<1x4x256xf32> to vector<4x256xf32>
    %c0_21 = arith.constant 0 : index
    %c2_22 = arith.constant 2 : index
    %c0_23 = arith.constant 0 : index
    %c0_24 = arith.constant 0 : index
    %20 = vector.load %arg1[%c0_21, %c2_22, %c0_23, %c0_24] : memref<1x4x256x25xf32, #tpu.memory_space<vmem>>, vector<1x1x256x25xf32>
    %21 = vector.shape_cast %20 : vector<1x1x256x25xf32> to vector<256x25xf32>
    %cst_25 = arith.constant dense<0.000000e+00> : vector<4x25xf32>
    %22 = tpu.matmul %19, %21, %cst_25 {dimension_numbers = #tpu.dot_dimension_numbers<[1], [0], [0], [1], [0, 0, 1, 1], [], []>} : vector<4x256xf32>, vector<256x25xf32>, vector<4x25xf32> -> vector<4x25xf32>
    %c2_26 = arith.constant 2 : index
    %c0_27 = arith.constant 0 : index
    %c0_28 = arith.constant 0 : index
    %23 = vector.load %arg3[%c2_26, %c0_27, %c0_28] : memref<4x4x1xf32, #tpu.memory_space<vmem>>, vector<1x4x1xf32>
    %24 = vector.shape_cast %23 : vector<1x4x1xf32> to vector<4x1xf32>
    %25 = vector.broadcast %24 : vector<4x1xf32> to vector<4x25xf32>
    %26 = arith.addf %22, %25 : vector<4x25xf32>
    %c3 = arith.constant 3 : index
    %c0_29 = arith.constant 0 : index
    %c0_30 = arith.constant 0 : index
    %27 = vector.load %arg2[%c3, %c0_29, %c0_30] : memref<4x4x256xf32, #tpu.memory_space<vmem>>, vector<1x4x256xf32>
    %28 = vector.shape_cast %27 : vector<1x4x256xf32> to vector<4x256xf32>
    %c0_31 = arith.constant 0 : index
    %c3_32 = arith.constant 3 : index
    %c0_33 = arith.constant 0 : index
    %c0_34 = arith.constant 0 : index
    %29 = vector.load %arg1[%c0_31, %c3_32, %c0_33, %c0_34] : memref<1x4x256x25xf32, #tpu.memory_space<vmem>>, vector<1x1x256x25xf32>
    %30 = vector.shape_cast %29 : vector<1x1x256x25xf32> to vector<256x25xf32>
    %cst_35 = arith.constant dense<0.000000e+00> : vector<4x25xf32>
    %31 = tpu.matmul %28, %30, %cst_35 {dimension_numbers = #tpu.dot_dimension_numbers<[1], [0], [0], [1], [0, 0, 1, 1], [], []>} : vector<4x256xf32>, vector<256x25xf32>, vector<4x25xf32> -> vector<4x25xf32>
    %c3_36 = arith.constant 3 : index
    %c0_37 = arith.constant 0 : index
    %c0_38 = arith.constant 0 : index
    %32 = vector.load %arg3[%c3_36, %c0_37, %c0_38] : memref<4x4x1xf32, #tpu.memory_space<vmem>>, vector<1x4x1xf32>
    %33 = vector.shape_cast %32 : vector<1x4x1xf32> to vector<4x1xf32>
    %34 = vector.broadcast %33 : vector<4x1xf32> to vector<4x25xf32>
    %35 = arith.addf %31, %34 : vector<4x25xf32>
    %c0_i32 = arith.constant 0 : i32
    %36 = vector.broadcast %c0_i32 : i32 to vector<4x25xi32>
    %37 = arith.cmpf ogt, %17, %8 : vector<4x25xf32>
    %38 = arith.select %37, %17, %8 : vector<4x25xi1>, vector<4x25xf32>
    %c1_i32 = arith.constant 1 : i32
    %39 = vector.broadcast %c1_i32 : i32 to vector<4x25xi32>
    %40 = arith.select %37, %39, %36 : vector<4x25xi1>, vector<4x25xi32>
    %41 = arith.cmpf ogt, %26, %38 : vector<4x25xf32>
    %42 = arith.select %41, %26, %38 : vector<4x25xi1>, vector<4x25xf32>
    %c2_i32 = arith.constant 2 : i32
    %43 = vector.broadcast %c2_i32 : i32 to vector<4x25xi32>
    %44 = arith.select %41, %43, %40 : vector<4x25xi1>, vector<4x25xi32>
    %45 = arith.cmpf ogt, %35, %42 : vector<4x25xf32>
    %46 = arith.select %45, %35, %42 : vector<4x25xi1>, vector<4x25xf32>
    %c3_i32 = arith.constant 3 : i32
    %47 = vector.broadcast %c3_i32 : i32 to vector<4x25xi32>
    %48 = arith.select %45, %47, %44 : vector<4x25xi1>, vector<4x25xi32>
    %c0_i32_39 = arith.constant 0 : i32
    %49 = vector.broadcast %c0_i32_39 : i32 to vector<4x25xi32>
    %50 = arith.cmpi eq, %48, %49 : vector<4x25xi32>
    %cst_40 = arith.constant 0xFF800000 : f32
    %51 = vector.broadcast %cst_40 : f32 to vector<4x25xf32>
    %52 = arith.select %50, %51, %8 : vector<4x25xi1>, vector<4x25xf32>
    %c1_i32_41 = arith.constant 1 : i32
    %53 = vector.broadcast %c1_i32_41 : i32 to vector<4x25xi32>
    %54 = arith.cmpi eq, %48, %53 : vector<4x25xi32>
    %cst_42 = arith.constant 0xFF800000 : f32
    %55 = vector.broadcast %cst_42 : f32 to vector<4x25xf32>
    %56 = arith.select %54, %55, %17 : vector<4x25xi1>, vector<4x25xf32>
    %c2_i32_43 = arith.constant 2 : i32
    %57 = vector.broadcast %c2_i32_43 : i32 to vector<4x25xi32>
    %58 = arith.cmpi eq, %48, %57 : vector<4x25xi32>
    %cst_44 = arith.constant 0xFF800000 : f32
    %59 = vector.broadcast %cst_44 : f32 to vector<4x25xf32>
    %60 = arith.select %58, %59, %26 : vector<4x25xi1>, vector<4x25xf32>
    %c3_i32_45 = arith.constant 3 : i32
    %61 = vector.broadcast %c3_i32_45 : i32 to vector<4x25xi32>
    %62 = arith.cmpi eq, %48, %61 : vector<4x25xi32>
    %cst_46 = arith.constant 0xFF800000 : f32
    %63 = vector.broadcast %cst_46 : f32 to vector<4x25xf32>
    %64 = arith.select %62, %63, %35 : vector<4x25xi1>, vector<4x25xf32>
    %65 = arith.cmpf ogt, %56, %52 : vector<4x25xf32>
    %66 = arith.select %65, %56, %52 : vector<4x25xi1>, vector<4x25xf32>
    %c1_i32_47 = arith.constant 1 : i32
    %67 = vector.broadcast %c1_i32_47 : i32 to vector<4x25xi32>
    %68 = arith.select %65, %67, %36 : vector<4x25xi1>, vector<4x25xi32>
    %69 = arith.cmpf ogt, %60, %66 : vector<4x25xf32>
    %70 = arith.select %69, %60, %66 : vector<4x25xi1>, vector<4x25xf32>
    %c2_i32_48 = arith.constant 2 : i32
    %71 = vector.broadcast %c2_i32_48 : i32 to vector<4x25xi32>
    %72 = arith.select %69, %71, %68 : vector<4x25xi1>, vector<4x25xi32>
    %73 = arith.cmpf ogt, %64, %70 : vector<4x25xf32>
    %74 = arith.select %73, %64, %70 : vector<4x25xi1>, vector<4x25xf32>
    %c3_i32_49 = arith.constant 3 : i32
    %75 = vector.broadcast %c3_i32_49 : i32 to vector<4x25xi32>
    %76 = arith.select %73, %75, %72 : vector<4x25xi1>, vector<4x25xi32>
    %77 = vector.shape_cast %46 : vector<4x25xf32> to vector<1x4x25xf32>
    %78 = vector.shape_cast %74 : vector<4x25xf32> to vector<1x4x25xf32>
    %79 = tpu.concatenate %77, %78 in 0 : vector<1x4x25xf32>, vector<1x4x25xf32> -> vector<2x4x25xf32>
    %c0_50 = arith.constant 0 : index
    %c0_51 = arith.constant 0 : index
    %c0_52 = arith.constant 0 : index
    %c0_53 = arith.constant 0 : index
    %80 = vector.load %arg4[%c0_50, %c0_51, %c0_52, %c0_53] : memref<1x2x4x25xf32, #tpu.memory_space<vmem>>, vector<1x2x4x25xf32>
    %81 = vector.shape_cast %80 : vector<1x2x4x25xf32> to vector<2x4x25xf32>
    %82 = vector.shape_cast %79 : vector<2x4x25xf32> to vector<1x2x4x25xf32>
    tpu.vector_store %arg4[%c0_50, %c0_51, %c0_52, %c0_53], %82 {strides = array<i32>} : memref<1x2x4x25xf32, #tpu.memory_space<vmem>>, vector<1x2x4x25xf32>,
    %83 = vector.shape_cast %48 : vector<4x25xi32> to vector<1x4x25xi32>
    %84 = vector.shape_cast %76 : vector<4x25xi32> to vector<1x4x25xi32>
    %85 = tpu.concatenate %83, %84 in 0 : vector<1x4x25xi32>, vector<1x4x25xi32> -> vector<2x4x25xi32>
    %c0_54 = arith.constant 0 : index
    %c0_55 = arith.constant 0 : index
    %c0_56 = arith.constant 0 : index
    %c0_57 = arith.constant 0 : index
    %86 = vector.load %arg5[%c0_54, %c0_55, %c0_56, %c0_57] : memref<1x2x4x25xi32, #tpu.memory_space<vmem>>, vector<1x2x4x25xi32>
    %87 = vector.shape_cast %86 : vector<1x2x4x25xi32> to vector<2x4x25xi32>
    %88 = vector.shape_cast %85 : vector<2x4x25xi32> to vector<1x2x4x25xi32>
    tpu.vector_store %arg5[%c0_54, %c0_55, %c0_56, %c0_57], %88 {strides = array<i32>} : memref<1x2x4x25xi32, #tpu.memory_space<vmem>>, vector<1x2x4x25xi32>,
    %89 = arith.cmpf olt, %17, %8 : vector<4x25xf32>
    %90 = arith.select %89, %17, %8 : vector<4x25xi1>, vector<4x25xf32>
    %c1_i32_58 = arith.constant 1 : i32
    %91 = vector.broadcast %c1_i32_58 : i32 to vector<4x25xi32>
    %92 = arith.select %89, %91, %36 : vector<4x25xi1>, vector<4x25xi32>
    %93 = arith.cmpf olt, %26, %90 : vector<4x25xf32>
    %94 = arith.select %93, %26, %90 : vector<4x25xi1>, vector<4x25xf32>
    %c2_i32_59 = arith.constant 2 : i32
    %95 = vector.broadcast %c2_i32_59 : i32 to vector<4x25xi32>
    %96 = arith.select %93, %95, %92 : vector<4x25xi1>, vector<4x25xi32>
    %97 = arith.cmpf olt, %35, %94 : vector<4x25xf32>
    %98 = arith.select %97, %35, %94 : vector<4x25xi1>, vector<4x25xf32>
    %c3_i32_60 = arith.constant 3 : i32
    %99 = vector.broadcast %c3_i32_60 : i32 to vector<4x25xi32>
    %100 = arith.select %97, %99, %96 : vector<4x25xi1>, vector<4x25xi32>
    %c0_i32_61 = arith.constant 0 : i32
    %101 = vector.broadcast %c0_i32_61 : i32 to vector<4x25xi32>
    %102 = arith.cmpi eq, %100, %101 : vector<4x25xi32>
    %cst_62 = arith.constant 0x7F800000 : f32
    %103 = vector.broadcast %cst_62 : f32 to vector<4x25xf32>
    %104 = arith.select %102, %103, %8 : vector<4x25xi1>, vector<4x25xf32>
    %c1_i32_63 = arith.constant 1 : i32
    %105 = vector.broadcast %c1_i32_63 : i32 to vector<4x25xi32>
    %106 = arith.cmpi eq, %100, %105 : vector<4x25xi32>
    %cst_64 = arith.constant 0x7F800000 : f32
    %107 = vector.broadcast %cst_64 : f32 to vector<4x25xf32>
    %108 = arith.select %106, %107, %17 : vector<4x25xi1>, vector<4x25xf32>
    %c2_i32_65 = arith.constant 2 : i32
    %109 = vector.broadcast %c2_i32_65 : i32 to vector<4x25xi32>
    %110 = arith.cmpi eq, %100, %109 : vector<4x25xi32>
    %cst_66 = arith.constant 0x7F800000 : f32
    %111 = vector.broadcast %cst_66 : f32 to vector<4x25xf32>
    %112 = arith.select %110, %111, %26 : vector<4x25xi1>, vector<4x25xf32>
    %c3_i32_67 = arith.constant 3 : i32
    %113 = vector.broadcast %c3_i32_67 : i32 to vector<4x25xi32>
    %114 = arith.cmpi eq, %100, %113 : vector<4x25xi32>
    %cst_68 = arith.constant 0x7F800000 : f32
    %115 = vector.broadcast %cst_68 : f32 to vector<4x25xf32>
    %116 = arith.select %114, %115, %35 : vector<4x25xi1>, vector<4x25xf32>
    %117 = arith.cmpf olt, %108, %104 : vector<4x25xf32>
    %118 = arith.select %117, %108, %104 : vector<4x25xi1>, vector<4x25xf32>
    %c1_i32_69 = arith.constant 1 : i32
    %119 = vector.broadcast %c1_i32_69 : i32 to vector<4x25xi32>
    %120 = arith.select %117, %119, %36 : vector<4x25xi1>, vector<4x25xi32>
    %121 = arith.cmpf olt, %112, %118 : vector<4x25xf32>
    %122 = arith.select %121, %112, %118 : vector<4x25xi1>, vector<4x25xf32>
    %c2_i32_70 = arith.constant 2 : i32
    %123 = vector.broadcast %c2_i32_70 : i32 to vector<4x25xi32>
    %124 = arith.select %121, %123, %120 : vector<4x25xi1>, vector<4x25xi32>
    %125 = arith.cmpf olt, %116, %122 : vector<4x25xf32>
    %126 = arith.select %125, %116, %122 : vector<4x25xi1>, vector<4x25xf32>
    %c3_i32_71 = arith.constant 3 : i32
    %127 = vector.broadcast %c3_i32_71 : i32 to vector<4x25xi32>
    %128 = arith.select %125, %127, %124 : vector<4x25xi1>, vector<4x25xi32>
    %129 = vector.shape_cast %98 : vector<4x25xf32> to vector<1x4x25xf32>
    %130 = vector.shape_cast %126 : vector<4x25xf32> to vector<1x4x25xf32>
    %131 = tpu.concatenate %129, %130 in 0 : vector<1x4x25xf32>, vector<1x4x25xf32> -> vector<2x4x25xf32>
    %c0_72 = arith.constant 0 : index
    %c0_73 = arith.constant 0 : index
    %c0_74 = arith.constant 0 : index
    %c0_75 = arith.constant 0 : index
    %132 = vector.load %arg6[%c0_72, %c0_73, %c0_74, %c0_75] : memref<1x2x4x25xf32, #tpu.memory_space<vmem>>, vector<1x2x4x25xf32>
    %133 = vector.shape_cast %132 : vector<1x2x4x25xf32> to vector<2x4x25xf32>
    %134 = vector.shape_cast %131 : vector<2x4x25xf32> to vector<1x2x4x25xf32>
    tpu.vector_store %arg6[%c0_72, %c0_73, %c0_74, %c0_75], %134 {strides = array<i32>} : memref<1x2x4x25xf32, #tpu.memory_space<vmem>>, vector<1x2x4x25xf32>,
    %135 = vector.shape_cast %100 : vector<4x25xi32> to vector<1x4x25xi32>
    %136 = vector.shape_cast %128 : vector<4x25xi32> to vector<1x4x25xi32>
    %137 = tpu.concatenate %135, %136 in 0 : vector<1x4x25xi32>, vector<1x4x25xi32> -> vector<2x4x25xi32>
    %c0_76 = arith.constant 0 : index
    %c0_77 = arith.constant 0 : index
    %c0_78 = arith.constant 0 : index
    %c0_79 = arith.constant 0 : index
    %138 = vector.load %arg7[%c0_76, %c0_77, %c0_78, %c0_79] : memref<1x2x4x25xi32, #tpu.memory_space<vmem>>, vector<1x2x4x25xi32>
    %139 = vector.shape_cast %138 : vector<1x2x4x25xi32> to vector<2x4x25xi32>
    %140 = vector.shape_cast %137 : vector<2x4x25xi32> to vector<1x2x4x25xi32>
    tpu.vector_store %arg7[%c0_76, %c0_77, %c0_78, %c0_79], %140 {strides = array<i32>} : memref<1x2x4x25xi32, #tpu.memory_space<vmem>>, vector<1x2x4x25xi32>,
    return
  }
  func.func @transform_0(%arg0: i32) -> (i32, i32, i32, i32) {
    %c0_i32 = arith.constant 0 : i32
    %c0_i32_0 = arith.constant 0 : i32
    %c0_i32_1 = arith.constant 0 : i32
    %c0_i32_2 = arith.constant 0 : i32
    return %arg0, %c0_i32, %c0_i32_0, %c0_i32_1 : i32, i32, i32, i32
  }
  func.func @transform_1(%arg0: i32) -> (i32, i32, i32) {
    %c0_i32 = arith.constant 0 : i32
    %c0_i32_0 = arith.constant 0 : i32
    %c0_i32_1 = arith.constant 0 : i32
    %c0_i32_2 = arith.constant 0 : i32
    return %c0_i32, %c0_i32_0, %c0_i32_1 : i32, i32, i32
  }
  func.func @transform_2(%arg0: i32) -> (i32, i32, i32) {
    %c0_i32 = arith.constant 0 : i32
    %c0_i32_0 = arith.constant 0 : i32
    %c0_i32_1 = arith.constant 0 : i32
    %c0_i32_2 = arith.constant 0 : i32
    return %c0_i32, %c0_i32_0, %c0_i32_1 : i32, i32, i32
  }
  func.func @transform_3(%arg0: i32) -> (i32, i32, i32, i32) {
    %c0_i32 = arith.constant 0 : i32
    %c0_i32_0 = arith.constant 0 : i32
    %c0_i32_1 = arith.constant 0 : i32
    %c0_i32_2 = arith.constant 0 : i32
    return %arg0, %c0_i32, %c0_i32_0, %c0_i32_1 : i32, i32, i32, i32
  }
  func.func @transform_4(%arg0: i32) -> (i32, i32, i32, i32) {
    %c0_i32 = arith.constant 0 : i32
    %c0_i32_0 = arith.constant 0 : i32
    %c0_i32_1 = arith.constant 0 : i32
    %c0_i32_2 = arith.constant 0 : i32
    return %arg0, %c0_i32, %c0_i32_0, %c0_i32_1 : i32, i32, i32, i32
  }
  func.func @transform_5(%arg0: i32) -> (i32, i32, i32, i32) {
    %c0_i32 = arith.constant 0 : i32
    %c0_i32_0 = arith.constant 0 : i32
    %c0_i32_1 = arith.constant 0 : i32
    %c0_i32_2 = arith.constant 0 : i32
    return %arg0, %c0_i32, %c0_i32_0, %c0_i32_1 : i32, i32, i32, i32
  }
  func.func @transform_6(%arg0: i32) -> (i32, i32, i32, i32) {
    %c0_i32 = arith.constant 0 : i32
    %c0_i32_0 = arith.constant 0 : i32
    %c0_i32_1 = arith.constant 0 : i32
    %c0_i32_2 = arith.constant 0 : i32
    return %arg0, %c0_i32, %c0_i32_0, %c0_i32_1 : i32, i32, i32, i32
  }
}

</mosaic_0001>

<bundles_post_ra>
// kernel: tpu_custom_call.1
= control target key start
LH: loop header
LB: loop body
LE: loop exit
PB: predicated region body
PF: predicated region fallthrough
CT: control target
= control target key end

     0   :  { %s1972_s0 = inlined_call_operand.vmem [shape: f32[2,4,256,25], index: 0, kind: input, shape index: {}]   ;;  %s1973_s1 = inlined_call_operand.vmem [shape: f32[4,4,256], index: 1, kind: input, shape index: {}]   ;;  %s1974_s2 = inlined_call_operand.vmem [shape: f32[4,4,1], index: 2, kind: input, shape index: {}]   ;;  %s1975_s3 = inlined_call_operand.hbm [shape: f32[2,2,4,25], index: 3, kind: output, shape index: {0}]   ;;  %s1976_s4 = inlined_call_operand.hbm [shape: s32[2,2,4,25], index: 4, kind: output, shape index: {1}]   ;;  %s1977_s5 = inlined_call_operand.hbm [shape: f32[2,2,4,25], index: 5, kind: output, shape index: {2}]   ;;  %s1978_s6 = inlined_call_operand.hbm [shape: s32[2,2,4,25], index: 6, kind: output, shape index: {3}]  }
   0x1   :  { %1983 = sst [smem:[#allocation14_spill]] %s1972_s0 }
   0x2   :  { %1984 = sst [smem:[#allocation15_spill]] %s1973_s1 }
   0x3   :  { %1985 = sst [smem:[#allocation16_spill]] %s1974_s2 }
   0x4   :  { %12 = vsyncpa [#allocation3], 0 }
   0x5   :  { %14 = vsyncpa [#allocation3 + $0x1], 0 }
   0x6   :  { %15 = vsyncpa [#allocation5], 0 }
   0x7   :  { %17 = vsyncpa [#allocation5 + $0x1], 0 }
   0x8   :  { %18 = vsyncpa [#allocation8], 0 }
   0x9   :  { %20 = vsyncpa [#allocation8 + $0x1], 0  ;;  %s1552_s21 = smov 0   ;;  %s1554_s22 = smov 0  }
   0xa   :  { %s1556_s23 = smov 0   ;;  %s1558_s24 = smov 0  }
   0xb LB: > { %1986 = sst [smem:[#allocation12_spill]] %s1504_s23  ;;  %s1573_s25 = sadd.s32 4294967295, %s1508_s24   ;;  %s1508_s24 = sphi %s1558_s24, %s2000_s24   ;;  %s1504_s23 = sphi %s1556_s23, %s1997_s23   ;;  %s1500_s22 = sphi %s1554_s22, %s1999_s22   ;;  %s1496_s21 = sphi %s1552_s21, %s1998_s21  }
   0xc   : > { %s1979_s26 = sadd.s32 4294967294, %s1508_s24   ;;  %s1577_s27 = sadd.s32 1, %s1508_s24  }
   0xd   : > { %s101_s28 = sadd.s32 1, %s1504_s23  ;;  %s98_s29 = ssub.s32 %s1508_s24, %s1577_s27 }
   0xe   : > { %p111_p0 = scmp.ne.s32.totalorder %s1504_s23, %s1500_s22  ;;  %p99_p1 = scmp.eq.s32.totalorder %s98_s29, 0 }
   0xf   : > { %p112_p2 = scmp.eq.s32.totalorder %s1573_s25, 1  ;;  %p117_p3 = scmp.ne.s32.totalorder %s1500_s22, %s1496_s21 }
  0x10   : > { %p118_p4 = scmp.eq.s32.totalorder %s1979_s26, 1  ;;  %p1031_p7 = scmp.ge.s32.totalorder %s1508_s24, 1 }
  0x11   : > { %s1590_s30 = scalar_select %p99_p1, %s1504_s23, %s101_s28  }
  0x12   : > { %p1592_p5 = por %p112_p2, %p111_p0  ;;  %p1596_p6 = por %p118_p4, %p117_p3 }
  0x13   : > { %1987 = sst [smem:[#allocation13_spill]] %s1590_s30  ;;  %p228_p8 = scmp.lt.s32.totalorder %s1508_s24, 3 }
  0x15   : > { %p229_p9 = pnand %p1031_p7, %p228_p8 }
  0x16   : > { %p273_p10 = scmp.lt.s32.totalorder (!%p229_p9), %s1573_s25, 1  ;;  %s1990_s1 = sld [smem:[#allocation15_spill]] (!%p229_p9) }
  0x17   : > { %232 = sbr.rel (%p229_p9) target bundleno = 398 (0x18e), region = 32  ;;  %s1991_s2 = sld [smem:[#allocation16_spill]] (!%p229_p9) }
  0x18   : > { %s1992_s0 = sld [smem:[#allocation14_spill]] (!%p229_p9)  ;;  %s1774_s16 = sand.u32 (!%p229_p9), 1, %s1500_s22  }
  0x19   : > { %s1777_s17 = sshll.u32 (!%p229_p9), %s1774_s16, 3  ;;  %s1783_s19 = sshll.u32 (!%p229_p9), %s1573_s25, 7 }
  0x1a   : > { %s1791_s28 = scalar_lea.vmem (!%p229_p9), [#allocation2], %s1777_s17  ;;  %s1796_s29 = scalar_lea.vmem (!%p229_p9), [#allocation6], %s1777_s17 }
  0x1b   : > { %s1810_s13 = scalar_lea.hbm (!%p229_p9), %s1976_s4, %s1783_s19  ;;  %s825_s14 = sshll.u32 (!%p229_p9), %s1791_s28, 4  ;;  %s1824_s14 = int_to_ptr.vmem [resolvable:$true] %s825_s14 }
  0x1c   : > { %v1606_v0 = vld [vmem:[%s1990_s1] sm:$0xff]  ;;  %v1611_v1 = vld [vmem:[%s1990_s1 + $0x8] sm:$0xff]  ;;  %v1510_v4 = vmov 0   ;;  %s274_s15 = scalar_select %p273_p10, %s1573_s25, 1  ;;  %vm761_vm2 = vcmask 199680  }
  0x1d   : > { %v318_v2 = vcombine.high %v1606_v0, %v1606_v0  ;;  %v433_v3 = vcombine.high %v1611_v1, %v1611_v1  ;;  %1356 = vset.pattern.permute.xlu0 %v1510_v4  ;;  %v311_v5 = vld [vmem:[%s1991_s2] sm:$0xf]  ;;  %1357 = vset.pattern.permute.xlu1 %v1510_v4  ;;  %v1105_v6 = vld [vmem:[%s1991_s2 + $0x8] sm:$0xf]  ;;  %v1071_v7 = vld [vmem:[%s1991_s2 + $0x4] sm:$0xf]  ;;  %s1821_s12 = scalar_lea.hbm %s1975_s3, %s1783_s19 }
  0x1e   : > { %314 = vperm.xlu0 %1356, %v311_v5   ;;  %s1154_s20 = sshll.u32 %s274_s15, 10  ;;  %544 = vperm.xlu1 %1357, %v1105_v6   ;;  %s857_s15 = sshll.u32 %s1796_s29, 4  ;;  %s1833_s15 = int_to_ptr.vmem [resolvable:$true] %s857_s15 }
  0x1f   : > { %384 = vmatprep.mubr.f32.mxu0 %v318_v2  ;;  %499 = vmatprep.mubr.f32.mxu1 %v433_v3  ;;  %s1632_s9 = scalar_lea.vmem %s1992_s0, %s1154_s20  ;;  %s1786_s20 = scalar_lea.vmem [#allocation4], %s1777_s17 }
  0x20   : > { %v310_v8 = vld [vmem:[%s1632_s9 + $0xf8] sm:$0xff]  ;;  %v309_v12 = vld [vmem:[%s1632_s9 + $0xf0] sm:$0xff]  ;;  %v308_v16 = vld [vmem:[%s1632_s9 + $0xe8] sm:$0xff]  ;;  %s841_s10 = sshll.u32 %s1786_s20, 4  ;;  %s1843_s0 = scalar_lea.hbm %s1978_s6, %s1783_s19  ;;  %s1814_s10 = int_to_ptr.vmem [resolvable:$true] %s841_s10 }
  0x21   : > { %v1070_v9 = vld [vmem:[%s1632_s9 + $0x1f8] sm:$0xff]  ;;  %1159 = vmatprep.subr.mxu0 %v310_v8  ;;  %v1069_v13 = vld [vmem:[%s1632_s9 + $0x1f0] sm:$0xff]  ;;  %v1068_v17 = vld [vmem:[%s1632_s9 + $0x1e8] sm:$0xff]  ;;  %s1993_s18 = sand.u32 1, %s1573_s25   ;;  %s1362_s30 = scalar_lea.vmem %s1814_s10, 128 }
  0x22   : > { %v294_v10 = vld [vmem:[%s1632_s9 + $0x78] sm:$0xff]  ;;  %429 = vperm.xlu0 %1356, %v1071_v7   ;;  %1194 = vmatprep.subr.mxu1 %v1070_v9  ;;  %v293_v14 = vld [vmem:[%s1632_s9 + $0x70] sm:$0xff]  ;;  %v292_v18 = vld [vmem:[%s1632_s9 + $0x68] sm:$0xff]  ;;  %p1363_p11 = scmp.ne.s32.totalorder %s1814_s10, %s1362_s30  ;;  %s1511_s23 = smov [#allocation4]  }
  0x23   : > { %v1054_v11 = vld [vmem:[%s1632_s9 + $0x178] sm:$0xff]  ;;  %1160 = vmatpush3.msra.mxu0 %v294_v10  ;;  %v1053_v15 = vld [vmem:[%s1632_s9 + $0x170] sm:$0xff]  ;;  %v1052_v19 = vld [vmem:[%s1632_s9 + $0x168] sm:$0xff] }
  0x24   : > { %1195 = vmatpush3.msra.mxu1 %v1054_v11  ;;  %1161 = vmatprep.subr.mxu0 %v309_v12  ;;  %v307_v20 = vld [vmem:[%s1632_s9 + $0xe0] sm:$0xff]  ;;  %v306_v24 = vld [vmem:[%s1632_s9 + $0xd8] sm:$0xff]  ;;  %v305_v28 = vld [vmem:[%s1632_s9 + $0xd0] sm:$0xff]  ;;  %p1364_p12 = pnand %p1363_p11, %p1592_p5 }
  0x25   : > { %1196 = vmatprep.subr.mxu1 %v1069_v13  ;;  %1162 = vmatpush3.msra.mxu0 %v293_v14  ;;  %v1067_v21 = vld [vmem:[%s1632_s9 + $0x1e0] sm:$0xff]  ;;  %v1066_v25 = vld [vmem:[%s1632_s9 + $0x1d8] sm:$0xff]  ;;  %v1065_v29 = vld [vmem:[%s1632_s9 + $0x1d0] sm:$0xff] }
  0x26   : > { %1197 = vmatpush3.msra.mxu1 %v1053_v15  ;;  %1163 = vmatprep.subr.mxu0 %v308_v16  ;;  %v291_v22 = vld [vmem:[%s1632_s9 + $0x60] sm:$0xff]  ;;  %v290_v26 = vld [vmem:[%s1632_s9 + $0x58] sm:$0xff]  ;;  %v289_v30 = vld [vmem:[%s1632_s9 + $0x50] sm:$0xff]  ;;  %p1365_p13 = pneg %p1364_p12 }
  0x27   : > { %1198 = vmatprep.subr.mxu1 %v1068_v17  ;;  %v1051_v23 = vld [vmem:[%s1632_s9 + $0x160] sm:$0xff]  ;;  %1164 = vmatpush3.msra.mxu0 %v292_v18  ;;  %v1050_v27 = vld [vmem:[%s1632_s9 + $0x158] sm:$0xff]  ;;  %v1049_v31 = vld [vmem:[%s1632_s9 + $0x150] sm:$0xff] }
  0x28   : > { %1199 = vmatpush3.msra.mxu1 %v1052_v19  ;;  %1165 = vmatprep.subr.mxu0 %v307_v20  ;;  %v304_v32 = vld [vmem:[%s1632_s9 + $0xc8] sm:$0xff]  ;;  %v303_v36 = vld [vmem:[%s1632_s9 + $0xc0] sm:$0xff]  ;;  %v302_v40 = vld [vmem:[%s1632_s9 + $0xb8] sm:$0xff] }
  0x29   : > { %1200 = vmatprep.subr.mxu1 %v1067_v21  ;;  %1166 = vmatpush3.msra.mxu0 %v291_v22  ;;  %v1064_v33 = vld [vmem:[%s1632_s9 + $0x1c8] sm:$0xff]  ;;  %v1063_v37 = vld [vmem:[%s1632_s9 + $0x1c0] sm:$0xff]  ;;  %v1062_v41 = vld [vmem:[%s1632_s9 + $0x1b8] sm:$0xff] }
  0x2a   : > { %1201 = vmatpush3.msra.mxu1 %v1051_v23  ;;  %1167 = vmatprep.subr.mxu0 %v306_v24  ;;  %v288_v34 = vld [vmem:[%s1632_s9 + $0x48] sm:$0xff]  ;;  %v287_v38 = vld [vmem:[%s1632_s9 + $0x40] sm:$0xff]  ;;  %v286_v42 = vld [vmem:[%s1632_s9 + $0x38] sm:$0xff] }
  0x2b   : > { %1202 = vmatprep.subr.mxu1 %v1066_v25  ;;  %1168 = vmatpush3.msra.mxu0 %v290_v26  ;;  %v1048_v35 = vld [vmem:[%s1632_s9 + $0x148] sm:$0xff]  ;;  %v1047_v39 = vld [vmem:[%s1632_s9 + $0x140] sm:$0xff]  ;;  %v1046_v43 = vld [vmem:[%s1632_s9 + $0x138] sm:$0xff] }
  0x2c   : > { %1203 = vmatpush3.msra.mxu1 %v1050_v27  ;;  %1169 = vmatprep.subr.mxu0 %v305_v28  ;;  %v301_v44 = vld [vmem:[%s1632_s9 + $0xb0] sm:$0xff]  ;;  %v300_v48 = vld [vmem:[%s1632_s9 + $0xa8] sm:$0xff]  ;;  %v299_v52 = vld [vmem:[%s1632_s9 + $0xa0] sm:$0xff] }
  0x2d   : > { %1204 = vmatprep.subr.mxu1 %v1065_v29  ;;  %1170 = vmatpush3.msra.mxu0 %v289_v30  ;;  %v1061_v45 = vld [vmem:[%s1632_s9 + $0x1b0] sm:$0xff]  ;;  %v1060_v49 = vld [vmem:[%s1632_s9 + $0x1a8] sm:$0xff]  ;;  %v1059_v53 = vld [vmem:[%s1632_s9 + $0x1a0] sm:$0xff] }
  0x2e   : > { %1205 = vmatpush3.msra.mxu1 %v1049_v31  ;;  %1171 = vmatprep.subr.mxu0 %v304_v32  ;;  %v285_v46 = vld [vmem:[%s1632_s9 + $0x30] sm:$0xff]  ;;  %v284_v50 = vld [vmem:[%s1632_s9 + $0x28] sm:$0xff]  ;;  %v283_v54 = vld [vmem:[%s1632_s9 + $0x20] sm:$0xff] }
  0x2f   : > { %1206 = vmatprep.subr.mxu1 %v1064_v33  ;;  %1172 = vmatpush3.msra.mxu0 %v288_v34  ;;  %v1045_v47 = vld [vmem:[%s1632_s9 + $0x130] sm:$0xff]  ;;  %v1044_v51 = vld [vmem:[%s1632_s9 + $0x128] sm:$0xff]  ;;  %v1043_v55 = vld [vmem:[%s1632_s9 + $0x120] sm:$0xff] }
  0x30   : > { %1207 = vmatpush3.msra.mxu1 %v1048_v35  ;;  %1173 = vmatprep.subr.mxu0 %v303_v36  ;;  %v298_v56 = vld [vmem:[%s1632_s9 + $0x98] sm:$0xff]  ;;  %v297_v60 = vld [vmem:[%s1632_s9 + $0x90] sm:$0xff]  ;;  %v296_v2 = vld [vmem:[%s1632_s9 + $0x88] sm:$0xff] }
  0x31   : > { %1208 = vmatprep.subr.mxu1 %v1063_v37  ;;  %1174 = vmatpush3.msra.mxu0 %v287_v38  ;;  %v1058_v57 = vld [vmem:[%s1632_s9 + $0x198] sm:$0xff]  ;;  %v1057_v61 = vld [vmem:[%s1632_s9 + $0x190] sm:$0xff]  ;;  %v1056_v3 = vld [vmem:[%s1632_s9 + $0x188] sm:$0xff] }
  0x32   : > { %1209 = vmatpush3.msra.mxu1 %v1047_v39  ;;  %1175 = vmatprep.subr.mxu0 %v302_v40  ;;  %v282_v58 = vld [vmem:[%s1632_s9 + $0x18] sm:$0xff]  ;;  %v281_v62 = vld [vmem:[%s1632_s9 + $0x10] sm:$0xff]  ;;  %v280_v5 = vld [vmem:[%s1632_s9 + $0x8] sm:$0xff] }
  0x33   : > { %1210 = vmatprep.subr.mxu1 %v1062_v41  ;;  %1176 = vmatpush3.msra.mxu0 %v286_v42  ;;  %v1042_v59 = vld [vmem:[%s1632_s9 + $0x118] sm:$0xff]  ;;  %v1041_v63 = vld [vmem:[%s1632_s9 + $0x110] sm:$0xff]  ;;  %v1040_v6 = vld [vmem:[%s1632_s9 + $0x108] sm:$0xff] }
  0x34   : > { %1211 = vmatpush3.msra.mxu1 %v1046_v43  ;;  %1177 = vmatprep.subr.mxu0 %v301_v44  ;;  %v295_v7 = vld [vmem:[%s1632_s9 + $0x80] sm:$0xff]  ;;  %v1104_v11 = vld [vmem:[%s1632_s9 + $0x2f8] sm:$0xff]  ;;  %v1103_v15 = vld [vmem:[%s1632_s9 + $0x2f0] sm:$0xff] }
  0x35   : > { %1212 = vmatprep.subr.mxu1 %v1061_v45  ;;  %1178 = vmatpush3.msra.mxu0 %v285_v46  ;;  %v1055_v8 = vld [vmem:[%s1632_s9 + $0x180] sm:$0xff]  ;;  %v1138_v12 = vld [vmem:[%s1632_s9 + $0x3f8] sm:$0xff]  ;;  %v1137_v16 = vld [vmem:[%s1632_s9 + $0x3f0] sm:$0xff] }
  0x36   : > { %1213 = vmatpush3.msra.mxu1 %v1045_v47  ;;  %1179 = vmatprep.subr.mxu0 %v300_v48  ;;  %v279_v9 = vld [vmem:[%s1632_s9] sm:$0xff]  ;;  %v1088_v13 = vld [vmem:[%s1632_s9 + $0x278] sm:$0xff]  ;;  %v1087_v17 = vld [vmem:[%s1632_s9 + $0x270] sm:$0xff] }
  0x37   : > { %1214 = vmatprep.subr.mxu1 %v1060_v49  ;;  %1180 = vmatpush3.msra.mxu0 %v284_v50  ;;  %v1039_v10 = vld [vmem:[%s1632_s9 + $0x100] sm:$0xff]  ;;  %v1122_v14 = vld [vmem:[%s1632_s9 + $0x378] sm:$0xff]  ;;  %v1121_v18 = vld [vmem:[%s1632_s9 + $0x370] sm:$0xff] }
  0x38   : > { %1215 = vmatpush3.msra.mxu1 %v1044_v51  ;;  %1181 = vmatprep.subr.mxu0 %v299_v52  ;;  %v1102_v19 = vld [vmem:[%s1632_s9 + $0x2e8] sm:$0xff]  ;;  %v1101_v21 = vld [vmem:[%s1632_s9 + $0x2e0] sm:$0xff]  ;;  %v1100_v25 = vld [vmem:[%s1632_s9 + $0x2d8] sm:$0xff] }
  0x39   : > { %1216 = vmatprep.subr.mxu1 %v1059_v53  ;;  %1182 = vmatpush3.msra.mxu0 %v283_v54  ;;  %v1136_v20 = vld [vmem:[%s1632_s9 + $0x3e8] sm:$0xff]  ;;  %v1135_v22 = vld [vmem:[%s1632_s9 + $0x3e0] sm:$0xff]  ;;  %v1134_v26 = vld [vmem:[%s1632_s9 + $0x3d8] sm:$0xff] }
  0x3a   : > { %1217 = vmatpush3.msra.mxu1 %v1043_v55  ;;  %1183 = vmatprep.subr.mxu0 %v298_v56  ;;  %v1085_v23 = vld [vmem:[%s1632_s9 + $0x260] sm:$0xff]  ;;  %v1084_v27 = vld [vmem:[%s1632_s9 + $0x258] sm:$0xff]  ;;  %v1099_v29 = vld [vmem:[%s1632_s9 + $0x2d0] sm:$0xff] }
  0x3b   : > { %1218 = vmatprep.subr.mxu1 %v1058_v57  ;;  %1184 = vmatpush3.msra.mxu0 %v282_v58  ;;  %v1119_v24 = vld [vmem:[%s1632_s9 + $0x360] sm:$0xff]  ;;  %v1118_v28 = vld [vmem:[%s1632_s9 + $0x358] sm:$0xff]  ;;  %v1133_v30 = vld [vmem:[%s1632_s9 + $0x3d0] sm:$0xff] }
  0x3c   : > { %1219 = vmatpush3.msra.mxu1 %v1042_v59  ;;  %1185 = vmatprep.subr.mxu0 %v297_v60  ;;  %v1083_v31 = vld [vmem:[%s1632_s9 + $0x250] sm:$0xff]  ;;  %v1098_v33 = vld [vmem:[%s1632_s9 + $0x2c8] sm:$0xff]  ;;  %v1097_v37 = vld [vmem:[%s1632_s9 + $0x2c0] sm:$0xff] }
  0x3d   : > { %1220 = vmatprep.subr.mxu1 %v1057_v61  ;;  %1186 = vmatpush3.msra.mxu0 %v281_v62  ;;  %v1117_v32 = vld [vmem:[%s1632_s9 + $0x350] sm:$0xff]  ;;  %v1132_v34 = vld [vmem:[%s1632_s9 + $0x3c8] sm:$0xff]  ;;  %v1131_v38 = vld [vmem:[%s1632_s9 + $0x3c0] sm:$0xff] }
  0x3e   : > { %1221 = vmatpush3.msra.mxu1 %v1041_v63  ;;  %1187 = vmatprep.subr.mxu0 %v296_v2  ;;  %v1082_v35 = vld [vmem:[%s1632_s9 + $0x248] sm:$0xff]  ;;  %v1081_v39 = vld [vmem:[%s1632_s9 + $0x240] sm:$0xff]  ;;  %v1096_v41 = vld [vmem:[%s1632_s9 + $0x2b8] sm:$0xff] }
  0x3f   : > { %1222 = vmatprep.subr.mxu1 %v1056_v3  ;;  %1188 = vmatpush3.msra.mxu0 %v280_v5  ;;  %v1116_v36 = vld [vmem:[%s1632_s9 + $0x348] sm:$0xff]  ;;  %v1115_v40 = vld [vmem:[%s1632_s9 + $0x340] sm:$0xff]  ;;  %v1130_v42 = vld [vmem:[%s1632_s9 + $0x3b8] sm:$0xff] }
  0x40   : > { %1223 = vmatpush3.msra.mxu1 %v1040_v6  ;;  %1189 = vmatprep.subr.mxu0 %v295_v7  ;;  %v1080_v43 = vld [vmem:[%s1632_s9 + $0x238] sm:$0xff]  ;;  %v1095_v45 = vld [vmem:[%s1632_s9 + $0x2b0] sm:$0xff]  ;;  %v1094_v49 = vld [vmem:[%s1632_s9 + $0x2a8] sm:$0xff] }
  0x41   : > { %1224 = vmatprep.subr.mxu1 %v1055_v8  ;;  %1190 = vmatpush3.msra.mxu0 %v279_v9  ;;  %v1114_v44 = vld [vmem:[%s1632_s9 + $0x338] sm:$0xff]  ;;  %v1129_v46 = vld [vmem:[%s1632_s9 + $0x3b0] sm:$0xff]  ;;  %v1128_v50 = vld [vmem:[%s1632_s9 + $0x3a8] sm:$0xff] }
  0x42   : > { %1225 = vmatpush3.msra.mxu1 %v1039_v10  ;;  %385 = vmatmul.mubr.f32.vlgmr.msra.gmra.mxu0 %v1606_v0  ;;  %v1086_v0 = vld [vmem:[%s1632_s9 + $0x268] sm:$0xff]  ;;  %v1079_v47 = vld [vmem:[%s1632_s9 + $0x230] sm:$0xff]  ;;  %v1093_v53 = vld [vmem:[%s1632_s9 + $0x2a0] sm:$0xff] }
  0x43   : > { %500 = vmatmul.mubr.f32.vlgmr.msra.gmra.mxu1 %v1611_v1  ;;  %1229 = vmatprep.subr.mxu0 %v1104_v11  ;;  %v1120_v1 = vld [vmem:[%s1632_s9 + $0x368] sm:$0xff]  ;;  %v1113_v48 = vld [vmem:[%s1632_s9 + $0x330] sm:$0xff]  ;;  %v1127_v54 = vld [vmem:[%s1632_s9 + $0x3a0] sm:$0xff] }
  0x44   : > { %1264 = vmatprep.subr.mxu1 %v1138_v12  ;;  %1230 = vmatpush3.msra.mxu0 %v1088_v13  ;;  %v1078_v51 = vld [vmem:[%s1632_s9 + $0x228] sm:$0xff]  ;;  %v1077_v55 = vld [vmem:[%s1632_s9 + $0x220] sm:$0xff]  ;;  %v1092_v57 = vld [vmem:[%s1632_s9 + $0x298] sm:$0xff] }
  0x45   : > { %1265 = vmatpush3.msra.mxu1 %v1122_v14  ;;  %1231 = vmatprep.subr.mxu0 %v1103_v15  ;;  %v1112_v52 = vld [vmem:[%s1632_s9 + $0x328] sm:$0xff]  ;;  %v1111_v56 = vld [vmem:[%s1632_s9 + $0x320] sm:$0xff]  ;;  %v1126_v58 = vld [vmem:[%s1632_s9 + $0x398] sm:$0xff] }
  0x46   : > { %1266 = vmatprep.subr.mxu1 %v1137_v16  ;;  %1232 = vmatpush3.msra.mxu0 %v1087_v17  ;;  %v1076_v59 = vld [vmem:[%s1632_s9 + $0x218] sm:$0xff]  ;;  %v1091_v61 = vld [vmem:[%s1632_s9 + $0x290] sm:$0xff]  ;;  %v1090_v5 = vld [vmem:[%s1632_s9 + $0x288] sm:$0xff] }
  0x47   : > { %1267 = vmatpush3.msra.mxu1 %v1121_v18  ;;  %1233 = vmatprep.subr.mxu0 %v1102_v19  ;;  %v1110_v60 = vld [vmem:[%s1632_s9 + $0x318] sm:$0xff]  ;;  %v1125_v62 = vld [vmem:[%s1632_s9 + $0x390] sm:$0xff]  ;;  %v1124_v6 = vld [vmem:[%s1632_s9 + $0x388] sm:$0xff] }
  0x48   : > { %1268 = vmatprep.subr.mxu1 %v1136_v20  ;;  %1234 = vmatpush3.msra.mxu0 %v1086_v0  ;;  %v1075_v63 = vld [vmem:[%s1632_s9 + $0x210] sm:$0xff]  ;;  %v1106_v7 = vld [vmem:[%s1990_s1 + $0x18] sm:$0xff]  ;;  %v1074_v8 = vld [vmem:[%s1632_s9 + $0x208] sm:$0xff] }
  0x49   : > { %1269 = vmatpush3.msra.mxu1 %v1120_v1  ;;  %1235 = vmatprep.subr.mxu0 %v1101_v21  ;;  %v1109_v2 = vld [vmem:[%s1632_s9 + $0x310] sm:$0xff]  ;;  %v1108_v9 = vld [vmem:[%s1632_s9 + $0x308] sm:$0xff]  ;;  %v1089_v10 = vld [vmem:[%s1632_s9 + $0x280] sm:$0xff]  ;;  %v663_v14 = vcombine.high %v1106_v7, %v1106_v7 }
  0x4a   : > { %1270 = vmatprep.subr.mxu1 %v1135_v22  ;;  %1236 = vmatpush3.msra.mxu0 %v1085_v23  ;;  %v1072_v3 = vld [vmem:[%s1990_s1 + $0x10] sm:$0xff]  ;;  %v1123_v11 = vld [vmem:[%s1632_s9 + $0x380] sm:$0xff]  ;;  %v1139_v16 = vld [vmem:[%s1991_s2 + $0xc] sm:$0xf]  ;;  %s1849_s2 = scalar_lea.sflag [#allocation5], %s1993_s18 }
  0x4b   : > { %1271 = vmatpush3.msra.mxu1 %v1119_v24  ;;  %1237 = vmatprep.subr.mxu0 %v1100_v25  ;;  %v548_v12 = vcombine.high %v1072_v3, %v1072_v3  ;;  %v1073_v13 = vld [vmem:[%s1632_s9 + $0x200] sm:$0xff] }
  0x4c   : > { %1272 = vmatprep.subr.mxu1 %v1134_v26  ;;  %1238 = vmatpush3.msra.mxu0 %v1084_v27  ;;  %v1107_v15 = vld [vmem:[%s1632_s9 + $0x300] sm:$0xff]  ;;  %s1801_s9 = scalar_lea.vmem [#allocation7], %s1777_s17  ;;  %s1830_s17 = scalar_lea.hbm %s1977_s5, %s1783_s19 }
  0x4d   : > { %1273 = vmatpush3.msra.mxu1 %v1118_v28  ;;  %1239 = vmatprep.subr.mxu0 %v1099_v29  ;;  %s873_s26 = sshll.u32 %s1801_s9, 4  ;;  %s1845_s26 = int_to_ptr.vmem [resolvable:$true] %s873_s26 }
  0x4e   : > { %1274 = vmatprep.subr.mxu1 %v1133_v30  ;;  %1240 = vmatpush3.msra.mxu0 %v1083_v31 }
  0x4f   : > { %1275 = vmatpush3.msra.mxu1 %v1117_v32  ;;  %1241 = vmatprep.subr.mxu0 %v1098_v33 }
  0x50   : > { %1276 = vmatprep.subr.mxu1 %v1132_v34  ;;  %1242 = vmatpush3.msra.mxu0 %v1082_v35 }
  0x51   : > { %1277 = vmatpush3.msra.mxu1 %v1116_v36  ;;  %1243 = vmatprep.subr.mxu0 %v1097_v37 }
  0x52   : > { %1278 = vmatprep.subr.mxu1 %v1131_v38  ;;  %1244 = vmatpush3.msra.mxu0 %v1081_v39 }
  0x53   : > { %1279 = vmatpush3.msra.mxu1 %v1115_v40  ;;  %1245 = vmatprep.subr.mxu0 %v1096_v41 }
  0x54   : > { %1280 = vmatprep.subr.mxu1 %v1130_v42  ;;  %1246 = vmatpush3.msra.mxu0 %v1080_v43 }
  0x55   : > { %1281 = vmatpush3.msra.mxu1 %v1114_v44  ;;  %1247 = vmatprep.subr.mxu0 %v1095_v45 }
  0x56   : > { %1282 = vmatprep.subr.mxu1 %v1129_v46  ;;  %1248 = vmatpush3.msra.mxu0 %v1079_v47 }
  0x57   : > { %1283 = vmatpush3.msra.mxu1 %v1113_v48  ;;  %1249 = vmatprep.subr.mxu0 %v1094_v49 }
  0x58   : > { %1284 = vmatprep.subr.mxu1 %v1128_v50  ;;  %1250 = vmatpush3.msra.mxu0 %v1078_v51 }
  0x59   : > { %1285 = vmatpush3.msra.mxu1 %v1112_v52  ;;  %1251 = vmatprep.subr.mxu0 %v1093_v53 }
  0x5a   : > { %1286 = vmatprep.subr.mxu1 %v1127_v54  ;;  %1252 = vmatpush3.msra.mxu0 %v1077_v55 }
  0x5b   : > { %1287 = vmatpush3.msra.mxu1 %v1111_v56  ;;  %1253 = vmatprep.subr.mxu0 %v1092_v57 }
  0x5c   : > { %1288 = vmatprep.subr.mxu1 %v1126_v58  ;;  %1254 = vmatpush3.msra.mxu0 %v1076_v59 }
  0x5d   : > { %1289 = vmatpush3.msra.mxu1 %v1110_v60  ;;  %1255 = vmatprep.subr.mxu0 %v1091_v61 }
  0x5e   : > { %1290 = vmatprep.subr.mxu1 %v1125_v62  ;;  %1256 = vmatpush3.msra.mxu0 %v1075_v63 }
  0x5f   : > { %1291 = vmatpush3.msra.mxu1 %v1109_v2  ;;  %1257 = vmatprep.subr.mxu0 %v1090_v5 }
  0x60   : > { %1292 = vmatprep.subr.mxu1 %v1124_v6  ;;  %1258 = vmatpush3.msra.mxu0 %v1074_v8 }
  0x61   : > { %1293 = vmatpush3.msra.mxu1 %v1108_v9  ;;  %1259 = vmatprep.subr.mxu0 %v1089_v10 }
  0x62   : > { %1294 = vmatprep.subr.mxu1 %v1123_v11  ;;  %1260 = vmatpush3.msra.mxu0 %v1073_v13 }
  0x63   : > { %614 = vmatprep.mubr.f32.mxu0 %v548_v12  ;;  %1295 = vmatpush3.msra.mxu1 %v1107_v15 }
  0x64   : > { %729 = vmatprep.mubr.f32.mxu1 %v663_v14  ;;  %615 = vmatmul.mubr.f32.vlgmr.msra.gmra.mxu0 %v1072_v3 }
  0x65   : > { %730 = vmatmul.mubr.f32.vlgmr.msra.gmra.mxu1 %v1106_v7  ;;  %659 = vperm.xlu1 %1357, %v1139_v16  }
  0x99   : > { %v315_v19 = vpop.permute.xlu0 %314  ;;  %v545_v25 = vpop.permute.xlu1 %544 }
  0x9d   : > { %v430_v22 = vpop.permute.xlu0 %429 }
  0xe0   : > { %v660_v36 = vpop.permute.xlu1 %659 }
 0x102   : > { %v1191_v17 = vpop.f32.mrf.mxu0 }
 0x103   : > { %v1226_v18 = vpop.f32.mrf.mxu1 }
 0x104   : > { %v1192_v20 = vpop.f32.mrf.mxu0 }
 0x105   : > { %v1227_v0 = vpop.f32.mrf.mxu1  ;;  %v1193_v1 = vadd.f32 %v1192_v20, %v1191_v17 }
 0x106   : > { %v1228_v21 = vadd.f32 %v1227_v0, %v1226_v18 }
 0x107   : > { %v387_v23 = vadd.f32 %v1193_v1, %v315_v19 }
 0x108   : > { %v502_v24 = vadd.f32 %v1228_v21, %v430_v22 }
 0x10a   : > { %vm735_vm0 = vcmp.gt.f32.partialorder %v502_v24, %v387_v23  ;;  %vm766_vm1 = vcmp.lt.f32.partialorder %v502_v24, %v387_v23 }
 0x10b   : > { %v736_v33 = vsel %vm735_vm0, %v502_v24, %v387_v23  ;;  %v737_v34 = vsel %vm735_vm0, 1, %v1510_v4  ;;  %v767_v35 = vsel %vm766_vm1, %v502_v24, %v387_v23  ;;  %v768_v37 = vsel %vm766_vm1, 1, %v1510_v4 }
 0x124   : > { %v1261_v26 = vpop.f32.mrf.mxu0 }
 0x125   : > { %v1296_v27 = vpop.f32.mrf.mxu1 }
 0x126   : > { %v1262_v28 = vpop.f32.mrf.mxu0 }
 0x127   : > { %v1297_v29 = vpop.f32.mrf.mxu1  ;;  %v1263_v30 = vadd.f32 %v1262_v28, %v1261_v26 }
 0x128   : > { %v1298_v31 = vadd.f32 %v1297_v29, %v1296_v27 }
 0x129   : > { %v617_v32 = vadd.f32 %v1263_v30, %v545_v25 }
 0x12a   : > { %v732_v38 = vadd.f32 %v1298_v31, %v660_v36 }
 0x12b   : > { %vm769_vm3 = vcmp.lt.f32.partialorder %v617_v32, %v767_v35  ;;  %vm738_vm4 = vcmp.gt.f32.partialorder %v617_v32, %v736_v33 }
 0x12c   : > { %v771_v39 = vsel %vm769_vm3, 2, %v768_v37  ;;  %v739_v40 = vsel %vm738_vm4, %v617_v32, %v736_v33  ;;  %v740_v41 = vsel %vm738_vm4, 2, %v737_v34  ;;  %v770_v42 = vsel %vm769_vm3, %v617_v32, %v767_v35 }
 0x12d   : > { %vm741_vm5 = vcmp.gt.f32.partialorder %v732_v38, %v739_v40  ;;  %vm772_vm6 = vcmp.lt.f32.partialorder %v732_v38, %v770_v42 }
 0x12e   : > { %v743_v43 = vsel %vm741_vm5, 3, %v740_v41  ;;  %v742_v44 = vsel %vm741_vm5, %v732_v38, %v739_v40  ;;  %v773_v45 = vsel %vm772_vm6, %v732_v38, %v770_v42  ;;  %v774_v46 = vsel %vm772_vm6, 3, %v771_v39 }
 0x12f   : > { %vm744_vm7 = vcmp.eq.s32.totalorder %v743_v43, 0  ;;  %vm746_vm8 = vcmp.eq.s32.totalorder %v743_v43, 1  ;;  %vm748_vm9 = vcmp.eq.s32.totalorder %v743_v43, 2  ;;  %764 = vst.msk [vmem:[%s1786_s20] sm:$0xf] %vm761_vm2, %v743_v43  ;;  %vm750_vm10 = vcmp.eq.s32.totalorder %v743_v43, 3 }
 0x130   : > { %762 = vst.msk [vmem:[%s1791_s28] sm:$0xf] %vm761_vm2, %v742_v44  ;;  %792 = vst.msk [vmem:[%s1796_s29] sm:$0xf] %vm761_vm2, %v773_v45  ;;  %v745_v47 = vsel %vm744_vm7, -inf, %v387_v23  ;;  %v747_v48 = vsel %vm746_vm8, -inf, %v502_v24 }
 0x131   : > { %794 = vst.msk [vmem:[%s1801_s9] sm:$0xf] %vm761_vm2, %v774_v46  ;;  %v749_v49 = vsel %vm748_vm9, -inf, %v617_v32  ;;  %vm752_vm11 = vcmp.gt.f32.partialorder %v747_v48, %v745_v47  ;;  %vm775_vm12 = vcmp.eq.s32.totalorder %v774_v46, 0  ;;  %vm777_vm13 = vcmp.eq.s32.totalorder %v774_v46, 1 }
 0x132   : > { %vm779_vm14 = vcmp.eq.s32.totalorder %v774_v46, 2  ;;  %v753_v50 = vsel %vm752_vm11, %v747_v48, %v745_v47  ;;  %v754_v51 = vsel %vm752_vm11, 1, %v1510_v4  ;;  %v776_v52 = vsel %vm775_vm12, inf, %v387_v23 }
 0x133   : > { %v778_v53 = vsel %vm777_vm13, inf, %v502_v24  ;;  %v751_v54 = vsel %vm750_vm10, -inf, %v732_v38  ;;  %vm755_vm15 = vcmp.gt.f32.partialorder %v749_v49, %v753_v50  ;;  %vm781_vm0 = vcmp.eq.s32.totalorder %v774_v46, 3 }
 0x134   : > { %vm783_vm1 = vcmp.lt.f32.partialorder %v778_v53, %v776_v52  ;;  %v756_v55 = vsel %vm755_vm15, %v749_v49, %v753_v50  ;;  %v757_v56 = vsel %vm755_vm15, 2, %v754_v51  ;;  %v780_v57 = vsel %vm779_vm14, inf, %v617_v32 }
 0x135   : > { %v784_v58 = vsel %vm783_vm1, %v778_v53, %v776_v52  ;;  %vm758_vm3 = vcmp.gt.f32.partialorder %v751_v54, %v756_v55  ;;  %v782_v59 = vsel %vm781_vm0, inf, %v732_v38  ;;  %v785_v60 = vsel %vm783_vm1, 1, %v1510_v4 }
 0x136   : > { %vm786_vm4 = vcmp.lt.f32.partialorder %v780_v57, %v784_v58  ;;  %v760_v61 = vsel %vm758_vm3, 3, %v757_v56  ;;  %v759_v62 = vsel %vm758_vm3, %v751_v54, %v756_v55 }
 0x137   : > { %v787_v63 = vsel %vm786_vm4, %v780_v57, %v784_v58  ;;  %v788_v2 = vsel %vm786_vm4, 2, %v785_v60  ;;  %765 = vst.msk [vmem:[%s1786_s20 + $0x4] sm:$0xf] %vm761_vm2, %v760_v61  ;;  %763 = vst.msk [vmem:[%s1791_s28 + $0x4] sm:$0xf] %vm761_vm2, %v759_v62  ;;  %s1366_s20 = sshll.u32 %s1511_s23, 4  ;;  %s1367_s20 = int_to_ptr.vmem [resolvable:$false] %s1366_s20 }
 0x138   : > { %vm789_vm5 = vcmp.lt.f32.partialorder %v782_v59, %v787_v63  ;;  %s1368_s28 = scalar_lea.vmem %s1367_s20, 256  ;;  %p1369_p0 = scmp.lt.s32.totalorder %s1814_s10, %s1367_s20 }
 0x139   : > { %p1370_p1 = scmp.lt.s32.totalorder %s1368_s28, %s1362_s30 }
 0x13b   : > { %p1371_p2 = por %p1370_p1, %p1369_p0 }
 0x13d   : > { %p1372_p3 = pnand %p1371_p2, %p1365_p13 }
 0x13f   : > { %1375 = shalt.err (!%p1372_p3)
}
 0x140   : > { %s1376_s1 = scalar_lea.hbm %s1810_s13, 128  ;;  %s1380_s23 = scalar_lea.hbm %s1976_s4, 256 }
 0x141   : > { %p1377_p4 = scmp.ne.s32.totalorder %s1810_s13, %s1376_s1  ;;  %p1381_p9 = scmp.lt.s32.totalorder %s1810_s13, %s1976_s4 }
 0x142   : > { %p1382_p10 = scmp.lt.s32.totalorder %s1380_s23, %s1376_s1 }
 0x143   : > { %p1378_p7 = pnand %p1377_p4, %p1592_p5 }
 0x144   : > { %p1383_p11 = por %p1382_p10, %p1381_p9 }
 0x145   : > { %p1379_p8 = pneg %p1378_p7 }
 0x147   : > { %p1384_p12 = pnand %p1383_p11, %p1379_p8 }
 0x149   : > { %1387 = shalt.err (!%p1384_p12)
}
 0x14a   : > { %s1981_s30 = smov 64   ;;  %s1513_s20 = smov 4   ;;  %v790_v4 = vsel %vm789_vm5, %v782_v59, %v787_v63  ;;  %v791_v3 = vsel %vm789_vm5, 3, %v788_v2 }
 0x14b   : > { %1300 = dma.vmem_to_hbm [thread:$0]  (%p1592_p5), %s1814_s10, 128, %s1810_s13, %s1849_s2, %s1981_s30, %s1981_s30, %s1513_s20  }
 0x14c   : > { %s797_s28 = scalar_lea.sflag [#allocation3], %s1774_s16  ;;  %s1388_s1 = scalar_lea.vmem %s1824_s14, 128 }
 0x14d   : > { %p1389_p13 = scmp.ne.s32.totalorder %s1824_s14, %s1388_s1  ;;  %s1514_s25 = smov [#allocation2]  }
 0x14e   : > { %s1392_s19 = sshll.u32 %s1514_s25, 4  ;;  %s1393_s19 = int_to_ptr.vmem [resolvable:$false] %s1392_s19 }
 0x14f   : > { %p1390_p0 = pnand %p1389_p13, %p1592_p5  ;;  %s1394_s23 = scalar_lea.vmem %s1393_s19, 256 }
 0x150   : > { %p1395_p2 = scmp.lt.s32.totalorder %s1824_s14, %s1393_s19  ;;  %p1396_p3 = scmp.lt.s32.totalorder %s1394_s23, %s1388_s1 }
 0x151   : > { %p1391_p1 = pneg %p1390_p0 }
 0x152   : > { %p1397_p4 = por %p1396_p3, %p1395_p2 }
 0x154   : > { %p1398_p7 = pnand %p1397_p4, %p1391_p1 }
 0x156   : > { %1401 = shalt.err (!%p1398_p7)
}
 0x157   : > { %s1402_s10 = scalar_lea.hbm %s1821_s12, 128  ;;  %s1406_s18 = scalar_lea.hbm %s1975_s3, 256 }
 0x158   : > { %p1403_p8 = scmp.ne.s32.totalorder %s1821_s12, %s1402_s10  ;;  %p1407_p11 = scmp.lt.s32.totalorder %s1821_s12, %s1975_s3 }
 0x159   : > { %p1408_p12 = scmp.lt.s32.totalorder %s1406_s18, %s1402_s10 }
 0x15a   : > { %p1404_p9 = pnand %p1403_p8, %p1592_p5 }
 0x15b   : > { %p1409_p13 = por %p1408_p12, %p1407_p11 }
 0x15c   : > { %p1405_p10 = pneg %p1404_p9 }
 0x15e   : > { %p1410_p0 = pnand %p1409_p13, %p1405_p10 }
 0x160   : > { %1413 = shalt.err (!%p1410_p0)
}
 0x161   : > { %s1994_s1 = smov 64   ;;  %793 = vst.msk [vmem:[%s1796_s29 + $0x4] sm:$0xf] %vm761_vm2, %v790_v4  ;;  %795 = vst.msk [vmem:[%s1801_s9 + $0x4] sm:$0xf] %vm761_vm2, %v791_v3  ;;  %s1414_s30 = scalar_lea.vmem %s1833_s15, 128 }
 0x162   : > { %1299 = dma.vmem_to_hbm [thread:$0]  (%p1592_p5), %s1824_s14, 128, %s1821_s12, %s797_s28, %s1994_s1, %s1994_s1, %s1513_s20  }
 0x163   : > { %p1415_p1 = scmp.ne.s32.totalorder %s1833_s15, %s1414_s30  ;;  %s1515_s19 = smov [#allocation6]  }
 0x164   : > { %s1418_s23 = sshll.u32 %s1515_s19, 4  ;;  %s1419_s23 = int_to_ptr.vmem [resolvable:$false] %s1418_s23 }
 0x165   : > { %p1416_p2 = pnand %p1415_p1, %p1592_p5  ;;  %s1420_s10 = scalar_lea.vmem %s1419_s23, 256 }
 0x166   : > { %p1421_p4 = scmp.lt.s32.totalorder %s1833_s15, %s1419_s23  ;;  %p1422_p7 = scmp.lt.s32.totalorder %s1420_s10, %s1414_s30 }
 0x167   : > { %p1417_p3 = pneg %p1416_p2 }
 0x168   : > { %p1423_p8 = por %p1422_p7, %p1421_p4 }
 0x16a   : > { %p1424_p9 = pnand %p1423_p8, %p1417_p3 }
 0x16c   : > { %1427 = shalt.err (!%p1424_p9)
}
 0x16d   : > { %s1428_s29 = scalar_lea.hbm %s1830_s17, 128  ;;  %s1432_s12 = scalar_lea.hbm %s1977_s5, 256 }
 0x16e   : > { %p1429_p10 = scmp.ne.s32.totalorder %s1830_s17, %s1428_s29  ;;  %p1433_p13 = scmp.lt.s32.totalorder %s1830_s17, %s1977_s5 }
 0x16f   : > { %p1434_p0 = scmp.lt.s32.totalorder %s1432_s12, %s1428_s29 }
 0x170   : > { %p1430_p11 = pnand %p1429_p10, %p1592_p5 }
 0x171   : > { %p1435_p1 = por %p1434_p0, %p1433_p13 }
 0x172   : > { %p1431_p12 = pneg %p1430_p11 }
 0x174   : > { %p1436_p2 = pnand %p1435_p1, %p1431_p12 }
 0x176   : > { %1439 = shalt.err (!%p1436_p2)
}
 0x177   : > { %1301 = dma.vmem_to_hbm [thread:$0]  (%p1592_p5), %s1833_s15, 128, %s1830_s17, %s1849_s2, %s1994_s1, %s1994_s1, %s1513_s20  }
 0x178   : > { %s812_s11 = scalar_lea.sflag [#allocation8], %s1774_s16  ;;  %s1440_s18 = scalar_lea.vmem %s1845_s26, 128 }
 0x179   : > { %p1441_p3 = scmp.ne.s32.totalorder %s1845_s26, %s1440_s18  ;;  %s1516_s25 = smov [#allocation7]  }
 0x17a   : > { %s1444_s30 = sshll.u32 %s1516_s25, 4  ;;  %s1445_s30 = int_to_ptr.vmem [resolvable:$false] %s1444_s30 }
 0x17b   : > { %p1442_p4 = pnand %p1441_p3, %p1592_p5  ;;  %s1446_s19 = scalar_lea.vmem %s1445_s30, 256 }
 0x17c   : > { %p1447_p8 = scmp.lt.s32.totalorder %s1845_s26, %s1445_s30  ;;  %p1448_p9 = scmp.lt.s32.totalorder %s1446_s19, %s1440_s18 }
 0x17d   : > { %p1443_p7 = pneg %p1442_p4 }
 0x17e   : > { %p1449_p10 = por %p1448_p9, %p1447_p8 }
 0x180   : > { %p1450_p11 = pnand %p1449_p10, %p1443_p7 }
 0x182   : > { %1453 = shalt.err (!%p1450_p11)
}
 0x183   : > { %s1454_s2 = scalar_lea.hbm %s1843_s0, 128  ;;  %s1458_s17 = scalar_lea.hbm %s1978_s6, 256 }
 0x184   : > { %p1455_p12 = scmp.ne.s32.totalorder %s1843_s0, %s1454_s2  ;;  %p1459_p1 = scmp.lt.s32.totalorder %s1843_s0, %s1978_s6 }
 0x185   : > { %p1460_p2 = scmp.lt.s32.totalorder %s1458_s17, %s1454_s2 }
 0x186   : > { %p1456_p13 = pnand %p1455_p12, %p1592_p5 }
 0x187   : > { %p1461_p3 = por %p1460_p2, %p1459_p1 }
 0x188   : > { %p1457_p0 = pneg %p1456_p13 }
 0x18a   : > { %p1462_p4 = pnand %p1461_p3, %p1457_p0 }
 0x18c   : > { %1465 = shalt.err (!%p1462_p4)
}
 0x18d   : > { %1302 = dma.vmem_to_hbm [thread:$0]  (%p1592_p5), %s1845_s26, 128, %s1843_s0, %s812_s11, %s1994_s1, %s1994_s1, %s1513_s20  }
 0x18e PF: > { %p1320_p7 = scmp.ge.s32.totalorder %s1508_s24, 2  ;;  %s888_s29 = sand.u32 1, %s1496_s21  }
 0x18f   : > { %s889_s9 = scalar_lea.sflag [#allocation3], %s888_s29 }
 0x190   : > { %p1308_p8 = pnand %p1320_p7, %p1596_p6 }
 0x192   : > { %p1309_p9 = pneg %p1308_p8 }
 0x194   : > { %1483 = dma.done.wait (%p1309_p9), %s889_s9, 128  }
 0x195   : > { %1485 = vsyncadd (%p1309_p9), %s889_s9, 4294967168  ;;  %s1995_s7 = sadd.s32 4294967294, %s1508_s24  }
 0x196   : > { %s897_s14 = sand.u32 1, %s1995_s7  }
 0x197   : > { %s898_s12 = scalar_lea.sflag [#allocation5], %s897_s14 }
 0x198   : > { %1487 = dma.done.wait (%p1309_p9), %s898_s12, 256  }
 0x199   : > { %1489 = vsyncadd (%p1309_p9), %s898_s12, 4294967040  ;;  %s916_s28 = scalar_lea.sflag [#allocation8], %s888_s29 }
 0x19a   : > { %1491 = dma.done.wait (%p1309_p9), %s916_s28, 128  }
 0x19b   : > { %1493 = vsyncadd (%p1309_p9), %s916_s28, 4294967168  ;;  %s1996_s26 = sld [smem:[#allocation12_spill]]  ;;  %p23_p5 = scmp.ge.s32.totalorder %s1577_s27, 4  }
 0x19c   : > { %s1997_s23 = sld [smem:[#allocation13_spill]]  ;;  %s1998_s21 = smov %s1500_s22 }
 0x19d   : > { %s2000_s24 = smov %s1577_s27  ;;  %25 = sbr.rel (!%p23_p5) target bundleno = 11 (0xb), region = 125 }
 0x1a1   : > { %s1999_s22 = smov %s1996_s26 }
 0x1a2   :  { %921 = vsyncpa [#allocation3], 1 }
 0x1a3   :  { %923 = vsyncpa [#allocation3 + $0x1], 1 }
 0x1a4   :  { %924 = vsyncpa [#allocation5], 1 }
 0x1a5   :  { %926 = vsyncpa [#allocation5 + $0x1], 1 }
 0x1a6   :  { %927 = vsyncpa [#allocation8], 1 }
 0x1a7   :  { %929 = vsyncpa [#allocation8 + $0x1], 1 }

</bundles_post_ra>
